<compile_context>
chip_gen: v7x
topology: tpu7x:2x2x1
jax: 0.10.0
libtpu: 0.0.40
codegen_flags: <defaults>
</compile_context>

<pallas_src>
import numpy as np
import jax
import jax.numpy as jnp
from jax.experimental import pallas as pl
from jax.experimental.pallas import tpu as pltpu

_BN_EPS = 1e-5
_EPS2 = 1e-24  # (F.normalize eps = 1e-12) ** 2


# ----------------------------- Pallas kernel --------------------------------
def _make_kernel(n_layers, use_residual, n_bones):
    B = n_bones

    def kernel(*refs):
        x_ref, out_ref = refs[0], refs[-1]
        x = x_ref[...].astype(jnp.float32)                 # [tm, C]
        r = 1
        h = x
        if n_layers > 0:
            # First eval-mode BatchNorm as per-channel scale/shift (BN_l for l>=1
            # is pre-folded into the preceding Linear weights).
            g = x * refs[r][...] + refs[r + 1][...]
            r += 2
            for _ in range(n_layers):
                # Swish.  (pl.reciprocal(..., approx=True) would move the divide
                # to the otherwise-idle EUP slot; kept exact so numerics match
                # the reference -- flip it if VALU ever becomes the binding slot.)
                a = g * (1.0 / (1.0 + jnp.exp(-g)))
                g = jnp.dot(a.astype(jnp.bfloat16), refs[r][...],
                            preferred_element_type=jnp.float32) + refs[r + 1][...]
                r += 2
            h = g
        if use_residual:
            h = h + x

        w_fc, b_fc, perm = refs[r][...], refs[r + 1][...], refs[r + 2][...]
        # Component-major head: raw[:, k*B + b] = component k (0..8) of bone b.
        raw = jnp.dot(h.astype(jnp.bfloat16), w_fc,
                      preferred_element_type=jnp.float32) + b_fc        # [tm, 9B]

        a1, a2, tr = raw[:, :3 * B], raw[:, 3 * B:6 * B], raw[:, 6 * B:]

        def csum(v):    # [tm, 3B] -> [tm, B]: x + y + z per bone
            return v[:, :B] + v[:, B:2 * B] + v[:, 2 * B:]

        def rep3(v):    # [tm, B] -> [tm, 3B]
            return jnp.concatenate([v, v, v], axis=-1)

        def norm3(v):   # F.normalize(v, dim=-1) on the grouped (x|y|z) layout
            return v * rep3(jax.lax.rsqrt(jnp.maximum(csum(v * v), _EPS2)))

        b1 = norm3(a1)
        b2 = norm3(a2 - rep3(csum(b1 * a2)) * b1)
        b1x, b1y, b1z = b1[:, :B], b1[:, B:2 * B], b1[:, 2 * B:]
        b2x, b2y, b2z = b2[:, :B], b2[:, B:2 * B], b2[:, 2 * B:]
        b3 = jnp.concatenate([b1y * b2z - b1z * b2y,       # b3 = b1 x b2
                              b1z * b2x - b1x * b2z,
                              b1x * b2y - b1y * b2x], axis=-1)

        cm = jnp.concatenate([b1, b2, b3, tr], axis=-1)    # [tm, 12B] component-major
        # Fold the component-major -> per-bone [B,12] layout change into one small
        # MXU matmul (0/1 permutation matrix): the kernel output leaves already in
        # the module's final order, killing the old post-kernel reshape/transpose.
        out = jnp.dot(cm.astype(jnp.bfloat16), perm,
                      preferred_element_type=jnp.float32)
        out_ref[...] = out.astype(out_ref.dtype)

    return kernel


# -------------------- one-time parameter preparation -------------------------
def prepare_params(p, *, n_bones, n_layers):
    """Load-time preprocessing (call ONCE, cache the result): eval-mode BN fold,
    BN_{l>=1} folded into the preceding Linear, bf16 weight casts, head-column
    permutation to component-major order, and the output permutation matrix."""
    B = n_bones
    C = p["w_fc"].shape[0]
    prep = {}
    if n_layers > 0:
        s = [(p["gamma"][l] * jax.lax.rsqrt(p["var"][l] + _BN_EPS)).reshape(1, C)
             for l in range(n_layers)]
        t = [(p["beta"][l].reshape(1, C) - p["mean"][l].reshape(1, C) * s[l])
             for l in range(n_layers)]
        prep["bn0_scale"] = s[0].astype(jnp.float32)
        prep["bn0_shift"] = t[0].astype(jnp.float32)
        ws, bs = [], []
        for l in range(n_layers):
            w = p["w"][l].astype(jnp.float32)
            b = p["b"][l].astype(jnp.float32).reshape(1, C)
            if l + 1 < n_layers:            # (h@W + b)*s + t == h@(W*s) + (b*s + t)
                w = w * s[l + 1]
                b = b * s[l + 1] + t[l + 1]
            ws.append(w.astype(jnp.bfloat16))
            bs.append(b)
        prep["w"], prep["b"] = ws, bs
    FC = 9 * B
    w_fc = p["w_fc"].astype(jnp.float32).reshape(C, B, 9)
    prep["w_fc"] = jnp.transpose(w_fc, (0, 2, 1)).reshape(C, FC).astype(jnp.bfloat16)
    b_fc = p["b_fc"].astype(jnp.float32).reshape(B, 9)
    prep["b_fc"] = jnp.transpose(b_fc, (1, 0)).reshape(1, FC)
    # Permutation: component-major lane c*B+b  ->  per-bone lane b*12+c.
    OUT = 12 * B
    c = np.repeat(np.arange(12), B)
    b = np.tile(np.arange(B), 12)
    perm = np.zeros((OUT, OUT), np.float32)
    perm[np.arange(OUT), b * 12 + c] = 1.0
    prep["perm"] = jnp.asarray(perm, dtype=jnp.bfloat16)
    return prep


# ------------------------------ JAX wrapper -----------------------------------
def cont6d_bone_transform_decoder(x, prep, *, n_bones, n_layers,
                                  use_residual=True, tm=512,
                                  out_dtype=jnp.bfloat16):
    """x: [..., C] pose codes -> [..., n_bones*12] per-bone 3x3 rotation + translation."""
    B = n_bones
    prefix = x.shape[:-1]
    C = x.shape[-1]
    xf = x.reshape(-1, C)                      # keep caller dtype: no extra cast pass
    T = xf.shape[0]

    # Row tiling: 16-row granules keep bf16 tiles natively packed; big tiles
    # amortize the ~0.35us per-grid-step overhead (sweep tm in 256..1024).
    tm = max(16, (int(tm) // 16) * 16)
    tm_eff = max(16, min(tm, pl.cdiv(T, 16) * 16))
    T_pad = pl.cdiv(T, tm_eff) * tm_eff
    if T_pad != T:
        xf = jnp.pad(xf, ((0, T_pad - T), (0, 0)))

    FC = 9 * B
    OUT = 12 * B

    full = lambda i: (0, 0)
    operands = [xf]
    in_specs = [pl.BlockSpec((tm_eff, C), lambda i: (i, 0))]
    if n_layers > 0:
        operands += [prep["bn0_scale"], prep["bn0_shift"]]
        in_specs += [pl.BlockSpec((1, C), full), pl.BlockSpec((1, C), full)]
        for l in range(n_layers):
            operands += [prep["w"][l], prep["b"][l]]
            in_specs += [pl.BlockSpec((C, C), full), pl.BlockSpec((1, C), full)]
    operands += [prep["w_fc"], prep["b_fc"], prep["perm"]]
    in_specs += [pl.BlockSpec((C, FC), full), pl.BlockSpec((1, FC), full),
                 pl.BlockSpec((OUT, OUT), full)]

    out_k = pl.pallas_call(
        _make_kernel(n_layers, use_residual, B),
        out_shape=jax.ShapeDtypeStruct((T_pad, OUT), out_dtype),
        grid_spec=pltpu.PrefetchScalarGridSpec(
            num_scalar_prefetch=0,
            grid=(T_pad // tm_eff,),
            in_specs=in_specs,
            out_specs=pl.BlockSpec((tm_eff, OUT), lambda i: (i, 0)),
        ),
        compiler_params=pltpu.CompilerParams(
            # "parallel" is safe on every generation; on v7x switch to
            # pltpu.CORE_PARALLEL (with an even grid-step count) to shard rows
            # across both TensorCores.
            dimension_semantics=("parallel",),
            vmem_limit_bytes=32 * 1024 * 1024,
        ),
    )(*operands)

    out = out_k if T_pad == T else out_k[:T]
    return out.reshape(prefix + (OUT,))


# -------------------------- references (for testing) --------------------------
def _reference_matched(x, prep, *, n_bones, n_layers, use_residual=True):
    """Mirrors the kernel numerics (folded BN, bf16 matmul operands, f32 accum)."""
    B = n_bones
    prefix = x.shape[:-1]
    C = x.shape[-1]
    xf = x.reshape(-1, C).astype(jnp.float32)
    h = xf
    if n_layers > 0:
        g = xf * prep["bn0_scale"] + prep["bn0_shift"]
        for l in range(n_layers):
            a = g * (1.0 / (1.0 + jnp.exp(-g)))
            g = jnp.dot(a.astype(jnp.bfloat16), prep["w"][l],
                        preferred_element_type=jnp.float32) + prep["b"][l]
        h = g
    if use_residual:
        h = h + xf
    raw = jnp.dot(h.astype(jnp.bfloat16), prep["w_fc"],
                  preferred_element_type=jnp.float32) + prep["b_fc"]
    T = raw.shape[0]
    r = jnp.transpose(raw.reshape(T, 9, B), (0, 2, 1))     # [T, bone, comp]
    a1, a2, t3 = r[..., 0:3], r[..., 3:6], r[..., 6:9]

    def nrm(v):
        return v * jax.lax.rsqrt(jnp.maximum(jnp.sum(v * v, -1, keepdims=True), _EPS2))

    b1 = nrm(a1)
    b2 = nrm(a2 - jnp.sum(b1 * a2, -1, keepdims=True) * b1)
    b3 = jnp.cross(b1, b2)
    out = jnp.concatenate([b1, b2, b3, t3], axis=-1)
    return out.reshape(prefix + (B * 12,))


def _reference_f32(x, p, *, n_bones, n_layers, use_residual=True):
    """Torch-faithful eval-mode forward in pure f32 (HIGHEST matmul precision)."""
    B = n_bones
    prefix = x.shape[:-1]
    C = x.shape[-1]
    h = x.reshape(-1, C).astype(jnp.float32)
    x0 = h
    for l in range(n_layers):
        h = ((h - p["mean"][l]) * jax.lax.rsqrt(p["var"][l] + _BN_EPS)
             * p["gamma"][l] + p["beta"][l])
        h = h * (1.0 / (1.0 + jnp.exp(-h)))
        h = jnp.dot(h, p["w"][l], precision=jax.lax.Precision.HIGHEST) + p["b"][l]
    if use_residual:
        h = h + x0
    raw = jnp.dot(h, p["w_fc"], precision=jax.lax.Precision.HIGHEST) + p["b_fc"]
    T = raw.shape[0]
    raw = raw.reshape(T, B, 9)
    a1, a2, t3 = raw[..., 0:3], raw[..., 3:6], raw[..., 6:9]

    def nrm(v):
        return v * jax.lax.rsqrt(jnp.maximum(jnp.sum(v * v, -1, keepdims=True), _EPS2))

    b1 = nrm(a1)
    b2 = nrm(a2 - jnp.sum(b1 * a2, -1, keepdims=True) * b1)
    b3 = jnp.cross(b1, b2)
    out = jnp.concatenate([b1, b2, b3, t3], axis=-1)
    return out.reshape(prefix + (B * 12,))


# ------------------------------ param setup -----------------------------------
def _init_raw_params(key, C, B, n_layers):
    keys = list(jax.random.split(key, 6 * n_layers + 2))
    it = iter(keys)
    p = dict(gamma=[], beta=[], mean=[], var=[], w=[], b=[])
    for _ in range(n_layers):
        p["gamma"].append(1.0 + 0.1 * jax.random.normal(next(it), (C,), jnp.float32))
        p["beta"].append(0.1 * jax.random.normal(next(it), (C,), jnp.float32))
        p["mean"].append(0.1 * jax.random.normal(next(it), (C,), jnp.float32))
        p["var"].append(1.0 + 0.1 * jax.random.uniform(next(it), (C,), jnp.float32))
        p["w"].append(jax.random.normal(next(it), (C, C), jnp.float32) / np.sqrt(C))
        p["b"].append(0.01 * jax.random.normal(next(it), (C,), jnp.float32))
    p["w_fc"] = jax.random.normal(next(it), (C, B * 9), jnp.float32) / np.sqrt(C)
    p["b_fc"] = 0.01 * jax.random.normal(next(it), (B * 9,), jnp.float32)
    return p


if __name__ == "__main__":
    key = jax.random.PRNGKey(0)
    kx, kp = jax.random.split(key)

    prefix = (3, 7)            # T = 21 flattened codes (exercises row padding)
    C, B, L = 128, 8, 2        # n_channels (module default), n_bones, n_layers

    x = jax.random.normal(kx, prefix + (C,), jnp.float32)
    raw_params = _init_raw_params(kp, C, B, L)
    prep = prepare_params(raw_params, n_bones=B, n_layers=L)   # one-time, load-time

    # Small tm here so the demo exercises a multi-step grid; default is 512.
    out = cont6d_bone_transform_decoder(x, prep, n_bones=B, n_layers=L,
                                        use_residual=True, tm=16)
    out = jax.block_until_ready(out)
    assert out.shape == prefix + (B * 12,)
    out_f = np.asarray(out.astype(jnp.float32))

    # Tight check against a reference that mirrors the kernel's numerics.
    ref_m = np.asarray(_reference_matched(x, prep, n_bones=B, n_layers=L,
                                          use_residual=True))
    np.testing.assert_allclose(out_f, ref_m, rtol=2e-2, atol=2e-2)

    # Against the torch-faithful pure-f32 reference, check the well-conditioned
    # outputs (first rotation row b1 and translation); b2/b3 are conditioning-
    # sensitive under bf16 and are covered by the matched check above.
    ref_32 = np.asarray(_reference_f32(x, raw_params, n_bones=B, n_layers=L,
                                       use_residual=True))
    o3 = out_f.reshape(-1, B, 12)
    r3 = ref_32.reshape(-1, B, 12)
    np.testing.assert_allclose(o3[..., 0:3], r3[..., 0:3], rtol=1e-1, atol=1e-1)
    np.testing.assert_allclose(o3[..., 9:12], r3[..., 9:12], rtol=1e-1, atol=1e-1)

    print("KERNEL_OK")
</pallas_src>

<mosaic_0001>
module attributes {stable_mosaic.version = 11 : i64} {
  func.func @kernel(%arg0: i32, %arg1: memref<16x128xf32, #tpu.memory_space<vmem>>, %arg2: memref<1x128xf32, #tpu.memory_space<vmem>>, %arg3: memref<1x128xf32, #tpu.memory_space<vmem>>, %arg4: memref<128x128xbf16, #tpu.memory_space<vmem>>, %arg5: memref<1x128xf32, #tpu.memory_space<vmem>>, %arg6: memref<128x128xbf16, #tpu.memory_space<vmem>>, %arg7: memref<1x128xf32, #tpu.memory_space<vmem>>, %arg8: memref<128x72xbf16, #tpu.memory_space<vmem>>, %arg9: memref<1x72xf32, #tpu.memory_space<vmem>>, %arg10: memref<96x96xbf16, #tpu.memory_space<vmem>>, %arg11: memref<16x96xbf16, #tpu.memory_space<vmem>>) attributes {dimension_semantics = [#tpu.dimension_semantics<parallel>], iteration_bounds = array<i64: 2>, scalar_prefetch = 0 : i64, scratch_operands = 0 : i64, tpu.core_type = #tpu.core_type<tc>, window_params = [{transform_indices = @transform_0, window_bounds = array<i64: 16, 128>}, {pipeline_mode = #tpu.pipeline_mode<synchronous>, transform_indices = @transform_1, window_bounds = array<i64: 1, 128>}, {pipeline_mode = #tpu.pipeline_mode<synchronous>, transform_indices = @transform_2, window_bounds = array<i64: 1, 128>}, {pipeline_mode = #tpu.pipeline_mode<synchronous>, transform_indices = @transform_3, window_bounds = array<i64: 128, 128>}, {pipeline_mode = #tpu.pipeline_mode<synchronous>, transform_indices = @transform_4, window_bounds = array<i64: 1, 128>}, {pipeline_mode = #tpu.pipeline_mode<synchronous>, transform_indices = @transform_5, window_bounds = array<i64: 128, 128>}, {pipeline_mode = #tpu.pipeline_mode<synchronous>, transform_indices = @transform_6, window_bounds = array<i64: 1, 128>}, {pipeline_mode = #tpu.pipeline_mode<synchronous>, transform_indices = @transform_7, window_bounds = array<i64: 128, 72>}, {pipeline_mode = #tpu.pipeline_mode<synchronous>, transform_indices = @transform_8, window_bounds = array<i64: 1, 72>}, {pipeline_mode = #tpu.pipeline_mode<synchronous>, transform_indices = @transform_9, window_bounds = array<i64: 96, 96>}, {transform_indices = @transform_10, window_bounds = array<i64: 16, 96>}]} {
    %c0 = arith.constant 0 : index
    %c0_0 = arith.constant 0 : index
    %0 = vector.load %arg1[%c0, %c0_0] : memref<16x128xf32, #tpu.memory_space<vmem>>, vector<16x128xf32>
    %c0_1 = arith.constant 0 : index
    %c0_2 = arith.constant 0 : index
    %1 = vector.load %arg2[%c0_1, %c0_2] : memref<1x128xf32, #tpu.memory_space<vmem>>, vector<1x128xf32>
    %2 = vector.broadcast %1 : vector<1x128xf32> to vector<16x128xf32>
    %3 = arith.mulf %0, %2 : vector<16x128xf32>
    %c0_3 = arith.constant 0 : index
    %c0_4 = arith.constant 0 : index
    %4 = vector.load %arg3[%c0_3, %c0_4] : memref<1x128xf32, #tpu.memory_space<vmem>>, vector<1x128xf32>
    %5 = vector.broadcast %4 : vector<1x128xf32> to vector<16x128xf32>
    %6 = arith.addf %3, %5 : vector<16x128xf32>
    %cst = arith.constant 0.000000e+00 : f32
    %7 = vector.broadcast %cst : f32 to vector<16x128xf32>
    %8 = arith.subf %7, %6 : vector<16x128xf32>
    %9 = math.exp %8 : vector<16x128xf32>
    %cst_5 = arith.constant 1.000000e+00 : f32
    %10 = vector.broadcast %cst_5 : f32 to vector<16x128xf32>
    %11 = arith.addf %10, %9 : vector<16x128xf32>
    %cst_6 = arith.constant 1.000000e+00 : f32
    %12 = vector.broadcast %cst_6 : f32 to vector<16x128xf32>
    %13 = arith.divf %12, %11 : vector<16x128xf32>
    %14 = arith.mulf %6, %13 : vector<16x128xf32>
    %15 = arith.truncf %14 : vector<16x128xf32> to vector<16x128xbf16>
    %c0_7 = arith.constant 0 : index
    %c0_8 = arith.constant 0 : index
    %16 = vector.load %arg4[%c0_7, %c0_8] : memref<128x128xbf16, #tpu.memory_space<vmem>>, vector<128x128xbf16>
    %cst_9 = arith.constant dense<0.000000e+00> : vector<16x128xf32>
    %17 = tpu.matmul %15, %16, %cst_9 {dimension_numbers = #tpu.dot_dimension_numbers<[1], [0], [0], [1], [0, 0, 1, 1], [], []>} : vector<16x128xbf16>, vector<128x128xbf16>, vector<16x128xf32> -> vector<16x128xf32>
    %c0_10 = arith.constant 0 : index
    %c0_11 = arith.constant 0 : index
    %18 = vector.load %arg5[%c0_10, %c0_11] : memref<1x128xf32, #tpu.memory_space<vmem>>, vector<1x128xf32>
    %19 = vector.broadcast %18 : vector<1x128xf32> to vector<16x128xf32>
    %20 = arith.addf %17, %19 : vector<16x128xf32>
    %cst_12 = arith.constant 0.000000e+00 : f32
    %21 = vector.broadcast %cst_12 : f32 to vector<16x128xf32>
    %22 = arith.subf %21, %20 : vector<16x128xf32>
    %23 = math.exp %22 : vector<16x128xf32>
    %cst_13 = arith.constant 1.000000e+00 : f32
    %24 = vector.broadcast %cst_13 : f32 to vector<16x128xf32>
    %25 = arith.addf %24, %23 : vector<16x128xf32>
    %cst_14 = arith.constant 1.000000e+00 : f32
    %26 = vector.broadcast %cst_14 : f32 to vector<16x128xf32>
    %27 = arith.divf %26, %25 : vector<16x128xf32>
    %28 = arith.mulf %20, %27 : vector<16x128xf32>
    %29 = arith.truncf %28 : vector<16x128xf32> to vector<16x128xbf16>
    %c0_15 = arith.constant 0 : index
    %c0_16 = arith.constant 0 : index
    %30 = vector.load %arg6[%c0_15, %c0_16] : memref<128x128xbf16, #tpu.memory_space<vmem>>, vector<128x128xbf16>
    %cst_17 = arith.constant dense<0.000000e+00> : vector<16x128xf32>
    %31 = tpu.matmul %29, %30, %cst_17 {dimension_numbers = #tpu.dot_dimension_numbers<[1], [0], [0], [1], [0, 0, 1, 1], [], []>} : vector<16x128xbf16>, vector<128x128xbf16>, vector<16x128xf32> -> vector<16x128xf32>
    %c0_18 = arith.constant 0 : index
    %c0_19 = arith.constant 0 : index
    %32 = vector.load %arg7[%c0_18, %c0_19] : memref<1x128xf32, #tpu.memory_space<vmem>>, vector<1x128xf32>
    %33 = vector.broadcast %32 : vector<1x128xf32> to vector<16x128xf32>
    %34 = arith.addf %31, %33 : vector<16x128xf32>
    %35 = arith.addf %34, %0 : vector<16x128xf32>
    %c0_20 = arith.constant 0 : index
    %c0_21 = arith.constant 0 : index
    %36 = vector.load %arg8[%c0_20, %c0_21] : memref<128x72xbf16, #tpu.memory_space<vmem>>, vector<128x72xbf16>
    %c0_22 = arith.constant 0 : index
    %c0_23 = arith.constant 0 : index
    %37 = vector.load %arg9[%c0_22, %c0_23] : memref<1x72xf32, #tpu.memory_space<vmem>>, vector<1x72xf32>
    %c0_24 = arith.constant 0 : index
    %c0_25 = arith.constant 0 : index
    %38 = vector.load %arg10[%c0_24, %c0_25] : memref<96x96xbf16, #tpu.memory_space<vmem>>, vector<96x96xbf16>
    %39 = arith.truncf %35 : vector<16x128xf32> to vector<16x128xbf16>
    %cst_26 = arith.constant dense<0.000000e+00> : vector<16x72xf32>
    %40 = tpu.matmul %39, %36, %cst_26 {dimension_numbers = #tpu.dot_dimension_numbers<[1], [0], [0], [1], [0, 0, 1, 1], [], []>} : vector<16x128xbf16>, vector<128x72xbf16>, vector<16x72xf32> -> vector<16x72xf32>
    %41 = vector.broadcast %37 : vector<1x72xf32> to vector<16x72xf32>
    %42 = arith.addf %40, %41 : vector<16x72xf32>
    %43 = vector.extract_strided_slice %42 {offsets = [0, 0], sizes = [16, 24], strides = [1, 1]} : vector<16x72xf32> to vector<16x24xf32>
    %44 = vector.extract_strided_slice %42 {offsets = [0, 24], sizes = [16, 24], strides = [1, 1]} : vector<16x72xf32> to vector<16x24xf32>
    %45 = vector.extract_strided_slice %42 {offsets = [0, 48], sizes = [16, 24], strides = [1, 1]} : vector<16x72xf32> to vector<16x24xf32>
    %46 = arith.mulf %43, %43 : vector<16x24xf32>
    %47 = vector.extract_strided_slice %46 {offsets = [0, 0], sizes = [16, 8], strides = [1, 1]} : vector<16x24xf32> to vector<16x8xf32>
    %48 = vector.extract_strided_slice %46 {offsets = [0, 8], sizes = [16, 8], strides = [1, 1]} : vector<16x24xf32> to vector<16x8xf32>
    %49 = arith.addf %47, %48 : vector<16x8xf32>
    %50 = vector.extract_strided_slice %46 {offsets = [0, 16], sizes = [16, 8], strides = [1, 1]} : vector<16x24xf32> to vector<16x8xf32>
    %51 = arith.addf %49, %50 : vector<16x8xf32>
    %cst_27 = arith.constant 1.000000e-24 : f32
    %52 = vector.broadcast %cst_27 : f32 to vector<16x8xf32>
    %53 = arith.maximumf %51, %52 : vector<16x8xf32>
    %54 = math.rsqrt %53 : vector<16x8xf32>
    %55 = tpu.concatenate %54, %54, %54 in 1 : vector<16x8xf32>, vector<16x8xf32>, vector<16x8xf32> -> vector<16x24xf32>
    %56 = arith.mulf %43, %55 : vector<16x24xf32>
    %57 = arith.mulf %56, %44 : vector<16x24xf32>
    %58 = vector.extract_strided_slice %57 {offsets = [0, 0], sizes = [16, 8], strides = [1, 1]} : vector<16x24xf32> to vector<16x8xf32>
    %59 = vector.extract_strided_slice %57 {offsets = [0, 8], sizes = [16, 8], strides = [1, 1]} : vector<16x24xf32> to vector<16x8xf32>
    %60 = arith.addf %58, %59 : vector<16x8xf32>
    %61 = vector.extract_strided_slice %57 {offsets = [0, 16], sizes = [16, 8], strides = [1, 1]} : vector<16x24xf32> to vector<16x8xf32>
    %62 = arith.addf %60, %61 : vector<16x8xf32>
    %63 = tpu.concatenate %62, %62, %62 in 1 : vector<16x8xf32>, vector<16x8xf32>, vector<16x8xf32> -> vector<16x24xf32>
    %64 = arith.mulf %63, %56 : vector<16x24xf32>
    %65 = arith.subf %44, %64 : vector<16x24xf32>
    %66 = arith.mulf %65, %65 : vector<16x24xf32>
    %67 = vector.extract_strided_slice %66 {offsets = [0, 0], sizes = [16, 8], strides = [1, 1]} : vector<16x24xf32> to vector<16x8xf32>
    %68 = vector.extract_strided_slice %66 {offsets = [0, 8], sizes = [16, 8], strides = [1, 1]} : vector<16x24xf32> to vector<16x8xf32>
    %69 = arith.addf %67, %68 : vector<16x8xf32>
    %70 = vector.extract_strided_slice %66 {offsets = [0, 16], sizes = [16, 8], strides = [1, 1]} : vector<16x24xf32> to vector<16x8xf32>
    %71 = arith.addf %69, %70 : vector<16x8xf32>
    %cst_28 = arith.constant 1.000000e-24 : f32
    %72 = vector.broadcast %cst_28 : f32 to vector<16x8xf32>
    %73 = arith.maximumf %71, %72 : vector<16x8xf32>
    %74 = math.rsqrt %73 : vector<16x8xf32>
    %75 = tpu.concatenate %74, %74, %74 in 1 : vector<16x8xf32>, vector<16x8xf32>, vector<16x8xf32> -> vector<16x24xf32>
    %76 = arith.mulf %65, %75 : vector<16x24xf32>
    %77 = vector.extract_strided_slice %56 {offsets = [0, 0], sizes = [16, 8], strides = [1, 1]} : vector<16x24xf32> to vector<16x8xf32>
    %78 = vector.extract_strided_slice %56 {offsets = [0, 8], sizes = [16, 8], strides = [1, 1]} : vector<16x24xf32> to vector<16x8xf32>
    %79 = vector.extract_strided_slice %56 {offsets = [0, 16], sizes = [16, 8], strides = [1, 1]} : vector<16x24xf32> to vector<16x8xf32>
    %80 = vector.extract_strided_slice %76 {offsets = [0, 0], sizes = [16, 8], strides = [1, 1]} : vector<16x24xf32> to vector<16x8xf32>
    %81 = vector.extract_strided_slice %76 {offsets = [0, 8], sizes = [16, 8], strides = [1, 1]} : vector<16x24xf32> to vector<16x8xf32>
    %82 = vector.extract_strided_slice %76 {offsets = [0, 16], sizes = [16, 8], strides = [1, 1]} : vector<16x24xf32> to vector<16x8xf32>
    %83 = arith.mulf %78, %82 : vector<16x8xf32>
    %84 = arith.mulf %79, %81 : vector<16x8xf32>
    %85 = arith.subf %83, %84 : vector<16x8xf32>
    %86 = arith.mulf %79, %80 : vector<16x8xf32>
    %87 = arith.mulf %77, %82 : vector<16x8xf32>
    %88 = arith.subf %86, %87 : vector<16x8xf32>
    %89 = arith.mulf %77, %81 : vector<16x8xf32>
    %90 = arith.mulf %78, %80 : vector<16x8xf32>
    %91 = arith.subf %89, %90 : vector<16x8xf32>
    %92 = tpu.concatenate %85, %88, %91 in 1 : vector<16x8xf32>, vector<16x8xf32>, vector<16x8xf32> -> vector<16x24xf32>
    %93 = tpu.concatenate %56, %76, %92, %45 in 1 : vector<16x24xf32>, vector<16x24xf32>, vector<16x24xf32>, vector<16x24xf32> -> vector<16x96xf32>
    %94 = arith.truncf %93 : vector<16x96xf32> to vector<16x96xbf16>
    %cst_29 = arith.constant dense<0.000000e+00> : vector<16x96xf32>
    %95 = tpu.matmul %94, %38, %cst_29 {dimension_numbers = #tpu.dot_dimension_numbers<[1], [0], [0], [1], [0, 0, 1, 1], [], []>} : vector<16x96xbf16>, vector<96x96xbf16>, vector<16x96xf32> -> vector<16x96xf32>
    %96 = arith.truncf %95 : vector<16x96xf32> to vector<16x96xbf16>
    %c0_30 = arith.constant 0 : index
    %c0_31 = arith.constant 0 : index
    %97 = vector.load %arg11[%c0_30, %c0_31] : memref<16x96xbf16, #tpu.memory_space<vmem>>, vector<16x96xbf16>
    tpu.vector_store %arg11[%c0_30, %c0_31], %96 {strides = array<i32>} : memref<16x96xbf16, #tpu.memory_space<vmem>>, vector<16x96xbf16>,
    return
  }
  func.func @transform_0(%arg0: i32) -> (i32, i32) {
    %c0_i32 = arith.constant 0 : i32
    %c0_i32_0 = arith.constant 0 : i32
    return %arg0, %c0_i32 : i32, i32
  }
  func.func @transform_1(%arg0: i32) -> (i32, i32) {
    %c0_i32 = arith.constant 0 : i32
    %c0_i32_0 = arith.constant 0 : i32
    %c0_i32_1 = arith.constant 0 : i32
    return %c0_i32, %c0_i32_0 : i32, i32
  }
  func.func @transform_2(%arg0: i32) -> (i32, i32) {
    %c0_i32 = arith.constant 0 : i32
    %c0_i32_0 = arith.constant 0 : i32
    %c0_i32_1 = arith.constant 0 : i32
    return %c0_i32, %c0_i32_0 : i32, i32
  }
  func.func @transform_3(%arg0: i32) -> (i32, i32) {
    %c0_i32 = arith.constant 0 : i32
    %c0_i32_0 = arith.constant 0 : i32
    %c0_i32_1 = arith.constant 0 : i32
    return %c0_i32, %c0_i32_0 : i32, i32
  }
  func.func @transform_4(%arg0: i32) -> (i32, i32) {
    %c0_i32 = arith.constant 0 : i32
    %c0_i32_0 = arith.constant 0 : i32
    %c0_i32_1 = arith.constant 0 : i32
    return %c0_i32, %c0_i32_0 : i32, i32
  }
  func.func @transform_5(%arg0: i32) -> (i32, i32) {
    %c0_i32 = arith.constant 0 : i32
    %c0_i32_0 = arith.constant 0 : i32
    %c0_i32_1 = arith.constant 0 : i32
    return %c0_i32, %c0_i32_0 : i32, i32
  }
  func.func @transform_6(%arg0: i32) -> (i32, i32) {
    %c0_i32 = arith.constant 0 : i32
    %c0_i32_0 = arith.constant 0 : i32
    %c0_i32_1 = arith.constant 0 : i32
    return %c0_i32, %c0_i32_0 : i32, i32
  }
  func.func @transform_7(%arg0: i32) -> (i32, i32) {
    %c0_i32 = arith.constant 0 : i32
    %c0_i32_0 = arith.constant 0 : i32
    %c0_i32_1 = arith.constant 0 : i32
    return %c0_i32, %c0_i32_0 : i32, i32
  }
  func.func @transform_8(%arg0: i32) -> (i32, i32) {
    %c0_i32 = arith.constant 0 : i32
    %c0_i32_0 = arith.constant 0 : i32
    %c0_i32_1 = arith.constant 0 : i32
    return %c0_i32, %c0_i32_0 : i32, i32
  }
  func.func @transform_9(%arg0: i32) -> (i32, i32) {
    %c0_i32 = arith.constant 0 : i32
    %c0_i32_0 = arith.constant 0 : i32
    %c0_i32_1 = arith.constant 0 : i32
    return %c0_i32, %c0_i32_0 : i32, i32
  }
  func.func @transform_10(%arg0: i32) -> (i32, i32) {
    %c0_i32 = arith.constant 0 : i32
    %c0_i32_0 = arith.constant 0 : i32
    return %arg0, %c0_i32 : i32, i32
  }
}

</mosaic_0001>

<bundles_post_ra>
// kernel: tpu_custom_call.1
= control target key start
LH: loop header
LB: loop body
LE: loop exit
PB: predicated region body
PF: predicated region fallthrough
CT: control target
= control target key end

     0   :  { %15 = vsyncpa [#allocation3], 0  ;;  %s2215_s0 = inlined_call_operand.hbm [shape: f32[32,128], index: 0, kind: input, shape index: {}]   ;;  %s2216_s1 = inlined_call_operand.vmem [shape: f32[1,128], index: 1, kind: input, shape index: {}]   ;;  %s2217_s2 = inlined_call_operand.vmem [shape: f32[1,128], index: 2, kind: input, shape index: {}]   ;;  %s2218_s3 = inlined_call_operand.vmem [shape: bf16[128,128], index: 3, kind: input, shape index: {}]   ;;  %s2219_s4 = inlined_call_operand.vmem [shape: f32[1,128], index: 4, kind: input, shape index: {}]   ;;  %s2220_s5 = inlined_call_operand.hbm [shape: bf16[128,128], index: 5, kind: input, shape index: {}]   ;;  %s2221_s6 = inlined_call_operand.vmem [shape: f32[1,128], index: 6, kind: input, shape index: {}]   ;;  %s2222_s7 = inlined_call_operand.vmem [shape: bf16[128,72], index: 7, kind: input, shape index: {}]   ;;  %s2223_s8 = inlined_call_operand.vmem [shape: f32[1,72], index: 8, kind: input, shape index: {}]   ;;  %s2224_s9 = inlined_call_operand.vmem [shape: bf16[96,96], index: 9, kind: input, shape index: {}]   ;;  %s2225_s10 = inlined_call_operand.hbm [shape: bf16[32,96], index: 10, kind: output, shape index: {}]  }
   0x1   :  { %17 = vsyncpa [#allocation3 + $0x1], 0 }
   0x2   :  { %18 = vsyncpa [#allocation6], 0 }
   0x3   :  { %19 = vsyncpa [#allocation4], 0 }
   0x4   :  { %21 = vsyncpa [#allocation4 + $0x1], 0  ;;  %s1778_s13 = smov 0   ;;  %s1780_s14 = smov 0  }
   0x5   :  { %s1782_s15 = smov 0   ;;  %s1784_s16 = smov 0  }
   0x6 LB: > { %2233 = sst [smem:[#allocation11_spill]] %s1689_s13  ;;  %s1799_s17 = sadd.s32 4294967295, %s1701_s16   ;;  %s1701_s16 = sphi %s1784_s16, %s2251_s16   ;;  %s1697_s15 = sphi %s1782_s15, %s2254_s15   ;;  %s1693_s14 = sphi %s1780_s14, %s2253_s14   ;;  %s1689_s13 = sphi %s1778_s13, %s2252_s13  }
   0x7   : > { %s1252_s18 = sadd.s32 4294967294, %s1701_s16   ;;  %p47_p0 = scmp.ne.s32.totalorder %s1693_s14, %s1689_s13 }
   0x8   : > { %p2228_p1 = scmp.eq.s32.totalorder %s1799_s17, 0  ;;  %p266_p3 = scmp.eq.s32.totalorder %s1252_s18, 1 }
   0x9   : > { %p1253_p5 = scmp.ge.s32.totalorder %s1701_s16, 1  ;;  %p273_p7 = scmp.lt.s32.totalorder %s1701_s16, 3 }
   0xa   : > { %p1808_p4 = por %p2228_p1, %p47_p0  ;;  %p1813_p6 = por %p266_p3, %p47_p0 }
   0xb   : > { %p1818_p8 = pnand %p1253_p5, %p273_p7  ;;  %s1703_s22 = smov [#allocation5]  }
   0xc   : > { %s2234_s19 = scalar_select %p1808_p4, 1, 0 }
   0xd   : > { %s2235_s20 = scalar_select %p1813_p6, 1, 0 }
   0xe   : > { %s2237_s21 = scalar_select %p1818_p8, 1, 0 }
   0xf   : > { %2236 = sst [smem:[#allocation12_spill]] %s2235_s20  ;;  %s297_s23 = sshll.u32 %s1703_s22, 4  ;;  %s1822_s23 = int_to_ptr.vmem [resolvable:$true] %s297_s23 }
  0x10   : > { %p1428_p9 = pneg %p1818_p8  ;;  %s1834_s25 = sadd.s32 1, %s1701_s16  }
  0x11   : > { %2239 = sst [smem:[#allocation13_spill]] %s1834_s25  ;;  %s34_s26 = sadd.s32 1, %s1697_s15 }
  0x12   : > { %p1829_p11 = pnand %p1428_p9, %p2228_p1  ;;  %s31_s27 = ssub.s32 %s1701_s16, %s1834_s25 }
  0x13   : > { %s1573_s30 = scalar_lea.hbm %s2220_s5, 1024 }
  0x14   : > { %p1574_p12 = scmp.ne.s32.totalorder %s2220_s5, %s1573_s30  ;;  %p1575_p13 = pneg %p1829_p11 }
  0x15   : > { %p1580_p5 = scmp.lt.u32.totalorder %s1573_s30, %s2220_s5 }
  0x16   : > { %p1576_p0 = pnand %p1575_p13, %p1574_p12 }
  0x18   : > { %p1577_p3 = pneg %p1576_p0 }
  0x1a   : > { %p1582_p7 = pnand %p1580_p5, %p1577_p3 }
  0x1c   : > { %1585 = shalt.err (!%p1582_p7)
}
  0x1d   : > { %s1586_s25 = scalar_lea.vmem %s1822_s23, 1024  ;;  %p1594_p2 = scmp.lt.s32.totalorder %s1822_s23, %s1822_s23 }
  0x1e   : > { %p1587_p9 = scmp.ne.s32.totalorder %s1822_s23, %s1586_s25  ;;  %p1595_p6 = scmp.lt.s32.totalorder %s1586_s25, %s1586_s25 }
  0x20   : > { %p1589_p10 = pnand %p1587_p9, %p1575_p13  ;;  %p1596_p4 = por %p1595_p6, %p1594_p2 }
  0x22   : > { %p1590_p1 = pneg %p1589_p10 }
  0x24   : > { %p1597_p8 = pnand %p1596_p4, %p1590_p1 }
  0x26   : > { %1600 = shalt.err (!%p1597_p8)
}
  0x27   : > { %s1704_s28 = smov 64   ;;  %s1705_s29 = smov 4  }
  0x28   : > { %1431 = dma.hbm_to_vmem [thread:$0]  (!%p1829_p11), %s2220_s5, 1024, %s1822_s23, [#allocation6], %s1704_s28, %s1704_s28, %s1705_s29  }
  0x29   : > { %p32_p2 = scmp.eq.s32.totalorder %s31_s27, 0  ;;  %p41_p1 = scmp.ne.s32.totalorder %s1697_s15, %s1693_s14 }
  0x2a   : > { %p42_p4 = scmp.eq.s32.totalorder %s1701_s16, 0  ;;  %p1441_p6 = scmp.lt.s32.totalorder %s1701_s16, 2 }
  0x2b   : > { %s1865_s25 = scalar_select %p32_p2, %s1697_s15, %s34_s26  }
  0x2c   : > { %p43_p8 = por %p42_p4, %p41_p1  ;;  %p2240_p10 = scmp.eq.s32.totalorder %s1799_s17, 1 }
  0x2d   : > { %s323_s18 = sand.u32 1, %s1697_s15   ;;  %s1306_s22 = sshll.u32 %s1701_s16, 8 }
  0x2e   : > { %p1869_p12 = por %p2240_p10, %p41_p1  ;;  %s1256_s20 = sshll.u32 %s323_s18, 4 }
  0x2f   : > { %s1878_s30 = scalar_lea.hbm %s2215_s0, %s1306_s22  ;;  %s327_s23 = scalar_lea.vmem [#allocation2], %s1256_s20 }
  0x30   : > { %s334_s26 = sshll.u32 %s327_s23, 4  ;;  %p1880_p11 = pnand %p1441_p6, %p43_p8  ;;  %s1884_s26 = int_to_ptr.vmem [resolvable:$true] %s334_s26 }
  0x31   : > { %s1886_s28 = scalar_lea.sflag [#allocation3], %s323_s18  ;;  %s1601_s29 = scalar_lea.hbm %s1878_s30, 256 }
  0x32   : > { %p1602_p13 = scmp.ne.s32.totalorder %s1878_s30, %s1601_s29  ;;  %p1603_p0 = pneg %p1880_p11 }
  0x33   : > { %s1606_s11 = scalar_lea.hbm %s2215_s0, 512  ;;  %p1607_p7 = scmp.lt.u32.totalorder %s1878_s30, %s2215_s0 }
  0x34   : > { %p1604_p3 = pnand %p1603_p0, %p1602_p13  ;;  %p1608_p9 = scmp.lt.u32.totalorder %s1606_s11, %s1601_s29 }
  0x35   : > { %p1610_p1 = scmp.lt.u32.totalorder %s1601_s29, %s1878_s30 }
  0x36   : > { %p1605_p5 = pneg %p1604_p3  ;;  %p1609_p2 = por %p1608_p9, %p1607_p7 }
  0x38   : > { %p1611_p4 = por %p1610_p1, %p1609_p2 }
  0x3a   : > { %p1612_p6 = pnand %p1611_p4, %p1605_p5 }
  0x3c   : > { %1615 = shalt.err (!%p1612_p6)
}
  0x3d   : > { %s1616_s18 = scalar_lea.vmem %s1884_s26, 256  ;;  %s1706_s23 = smov [#allocation2]  }
  0x3e   : > { %p1617_p8 = scmp.ne.s32.totalorder %s1884_s26, %s1616_s18  ;;  %s1621_s13 = sshll.u32 %s1706_s23, 4  ;;  %s1622_s13 = int_to_ptr.vmem [resolvable:$false] %s1621_s13 }
  0x3f   : > { %s1623_s20 = scalar_lea.vmem %s1622_s13, 512  ;;  %p1624_p3 = scmp.lt.s32.totalorder %s1884_s26, %s1622_s13 }
  0x40   : > { %p1619_p10 = pnand %p1617_p8, %p1603_p0  ;;  %p1625_p7 = scmp.lt.s32.totalorder %s1623_s20, %s1616_s18 }
  0x42   : > { %p1620_p13 = pneg %p1619_p10  ;;  %p1626_p9 = por %p1625_p7, %p1624_p3 }
  0x44   : > { %p1627_p2 = pnand %p1626_p9, %p1620_p13 }
  0x46   : > { %1630 = shalt.err (!%p1627_p2)
}
  0x47   : > { %s1707_s29 = smov 128   ;;  %s1708_s11 = smov 8  }
  0x48   : > { %1435 = dma.hbm_to_vmem [thread:$0]  (!%p1880_p11), %s1878_s30, 256, %s1884_s26, %s1886_s28, %s1707_s29, %s1707_s29, %s1708_s11  }
  0x49   : > { %p2243_p0 = scmp.ne.s32.totalorder %s2237_s21, 0 }
  0x4a   : > { %s1917_s22 = sand.u32 (!%p2243_p0), 1, %s1693_s14   ;;  %p2244_p5 = scmp.ne.s32.totalorder (!%p2243_p0), %s2234_s19, 0 }
  0x4b   : > { %346 = sbr.rel (%p2243_p0) target bundleno = 2521 (0x9d9), region = 60  ;;  %s1260_s24 = sshll.u32 (!%p2243_p0), %s1917_s22, 4 }
  0x4c   : > { %s349_s18 = scalar_lea.sflag (!%p2243_p0), [#allocation3], %s1917_s22  ;;  %s352_s23 = scalar_lea.vmem (!%p2243_p0), [#allocation2], %s1260_s24 }
  0x52   : > { %1676 = dma.done.wait (%p2244_p5), %s349_s18, 256  }
  0x53   : > { %1678 = vsyncadd (%p2244_p5), %s349_s18, 4294967040  ;;  %p2245_p1 = scmp.eq.s32.totalorder %s1799_s17, 0 }
  0x55   : > { %1680 = dma.done.wait (%p2245_p1), [#allocation6], 1024   ;;  %p2246_p11 = pmov %p2245_p1 }
  0x56   : > { %v1709_v0 = vmov 0.0   ;;  %vm1710_vm0 = vmmov 0   ;;  %v1519_v1 = vld [vmem:[%s2218_s3] sm:$0xff]   ;;  %v1520_v2 = vld [vmem:[%s2218_s3 + $0x8] sm:$0xff]   ;;  %v1521_v3 = vld [vmem:[%s2218_s3 + $0x10] sm:$0xff]   ;;  %s1711_s26 = smov 112  }
  0x57   : > { %1682 = vsyncadd (%p2246_p11), [#allocation6], 4294966272  ;;  %1344 = vmatprep.subr.bf16.mxu0 %v1709_v0  ;;  %1360 = vmatprep.mubr.msk.bf16.mxu0 %vm1710_vm0, %v1709_v0  ;;  %v1946_v4 = vld [vmem:[%s352_s23] sm:$0xff]  ;;  %v1948_v5 = vld [vmem:[%s352_s23 + $0x8] sm:$0xff]  ;;  %s1712_s27 = smov 120   ;;  %s1713_s28 = smov 8  }
  0x58   : > { %1364 = vmatprep.subr.bf16.mxu1 %v1709_v0  ;;  %1380 = vmatprep.mubr.msk.bf16.mxu1 %vm1710_vm0, %v1709_v0  ;;  %v1263_v6 = vld [vmem:[%s2216_s1] ss:$0 sm:$0xff]  ;;  %v1522_v7 = vld [vmem:[%s2218_s3 + $0x18] sm:$0xff]   ;;  %v1524_v18 = vld [vmem:[%s2218_s3 + $0x28] sm:$0xff]   ;;  %s1714_s13 = smov 16   ;;  %s1715_s20 = smov 104  }
  0x59   : > { %1345 = vmatpush3.bf16.msra.mxu0 %v1519_v1  ;;  %v405_v8 = vmul.f32 %v1263_v6, %v1946_v4  ;;  %v406_v9 = vmul.f32 %v1263_v6, %v1948_v5  ;;  %v1264_v10 = vld [vmem:[%s2217_s2] ss:$0 sm:$0xff]  ;;  %v1525_v19 = vld [vmem:[%s2218_s3 + $0x30] sm:$0xff]   ;;  %v1526_v20 = vld [vmem:[%s2218_s3 + $0x38] sm:$0xff]   ;;  %vm835_vm1 = vcmask 64512   ;;  %vm838_vm2 = vcmask 130048  }
  0x5a   : > { %1346 = vmatprep.subr.bf16.mxu0 %v1709_v0  ;;  %v1523_v13 = vld [vmem:[%s2218_s3 + $0x20] sm:$0xff]   ;;  %v1528_v31 = vld [vmem:[#allocation5 + $0x8] sm:$0xff]   ;;  %v1529_v32 = vld [vmem:[#allocation5 + $0x10] sm:$0xff]   ;;  %s1716_s29 = smov 24   ;;  %s1717_s11 = smov 88   ;;  %vm1053_vm3 = vcmask 195584  }
  0x5b   : > { %v414_v11 = vadd.f32 %v1264_v10, %v405_v8  ;;  %v415_v12 = vadd.f32 %v1264_v10, %v406_v9  ;;  %v1527_v30 = vld [vmem:[#allocation5] sm:$0xff]   ;;  %v1530_v33 = vld [vmem:[#allocation5 + $0x18] sm:$0xff]   ;;  %v1532_v35 = vld [vmem:[#allocation5 + $0x28] sm:$0xff]   ;;  %s1718_s24 = smov 96   ;;  %vm1056_vm4 = vcmask 392192   ;;  %vm1059_vm5 = vcmask 588800  }
  0x5c   : > { %1365 = vmatpush3.bf16.msra.mxu1 %v1527_v30  ;;  %v1531_v34 = vld [vmem:[#allocation5 + $0x20] sm:$0xff]   ;;  %v1533_v36 = vld [vmem:[#allocation5 + $0x30] sm:$0xff]   ;;  %v1534_v37 = vld [vmem:[#allocation5 + $0x38] sm:$0xff]   ;;  %vm1099_vm6 = vcmask 785408   ;;  %s1262_s18 = sshll.u32 %s1917_s22, 3  ;;  %s1309_s21 = sshll.u32 %s1799_s17, 7 }
  0x5d   : > { %1347 = vmatpush3.bf16.msra.mxu0 %v1520_v2  ;;  %v416_v14 = vsub.f32 0.0, %v414_v11  ;;  %v417_v15 = vsub.f32 0.0, %v415_v12  ;;  %1366 = vmatprep.subr.bf16.mxu1 %v1709_v0  ;;  %v1535_v38 = vld [vmem:[%s2222_s7] sm:$0xff]   ;;  %v1536_v39 = vld [vmem:[%s2222_s7 + $0x8] sm:$0xff]   ;;  %v1537_v40 = vld [vmem:[%s2222_s7 + $0x10] sm:$0xff]   ;;  %s392_s23 = scalar_lea.vmem [#allocation7], %s1262_s18 }
  0x5e   : > { %1348 = vmatprep.subr.bf16.mxu0 %v1709_v0  ;;  %v1538_v41 = vld [vmem:[%s2222_s7 + $0x18] sm:$0xff]   ;;  %v1539_v42 = vld [vmem:[%s2222_s7 + $0x20] sm:$0xff]   ;;  %v1540_v43 = vld [vmem:[%s2222_s7 + $0x28] sm:$0xff]   ;;  %s1169_s19 = sshll.u32 %s392_s23, 4  ;;  %vm1152_vm7 = vcmask 781312   ;;  %s1156_s17 = scalar_lea.sflag [#allocation4], %s1917_s22  ;;  %s2166_s19 = int_to_ptr.vmem [resolvable:$true] %s1169_s19 }
  0x5f   : > { %v418_v16 = vmul.f32 1.442695, %v416_v14  ;;  %v420_v17 = vmul.f32 1.442695, %v417_v15  ;;  %v1265_v44 = vld [vmem:[%s2219_s4] ss:$0 sm:$0xff] }
  0x60   : > { %1367 = vmatpush3.bf16.msra.mxu1 %v1528_v31  ;;  %v1541_v1 = vld [vmem:[%s2222_s7 + $0x30] sm:$0xff]   ;;  %v1542_v2 = vld [vmem:[%s2222_s7 + $0x38] sm:$0xff]   ;;  %v1283_v15 = vld [vmem:[%s2223_s8] ss:$0 sm:$0xff] }
  0x61   : > { %1349 = vmatpush3.bf16.msra.mxu0 %v1521_v3  ;;  %1549 = vpow2.f32 %v418_v16  ;;  %1368 = vmatprep.subr.bf16.mxu1 %v1709_v0  ;;  %v1274_v3 = vld [vmem:[%s2221_s6] ss:$0 sm:$0xff] }
  0x62   : > { %1350 = vmatprep.subr.bf16.mxu0 %v1709_v0  ;;  %1551 = vpow2.f32 %v420_v17 }
  0x64   : > { %1369 = vmatpush3.bf16.msra.mxu1 %v1529_v32 }
  0x65   : > { %1351 = vmatpush3.bf16.msra.mxu0 %v1522_v7  ;;  %1370 = vmatprep.subr.bf16.mxu1 %v1709_v0 }
  0x66   : > { %1352 = vmatprep.subr.bf16.mxu0 %v1709_v0 }
  0x68   : > { %1371 = vmatpush3.bf16.msra.mxu1 %v1530_v33 }
  0x69   : > { %1353 = vmatpush3.bf16.msra.mxu0 %v1523_v13  ;;  %1372 = vmatprep.subr.bf16.mxu1 %v1709_v0 }
  0x6a   : > { %1354 = vmatprep.subr.bf16.mxu0 %v1709_v0 }
  0x6b   : > { %v1550_v21 = vpop.eup %1549 }
  0x6c   : > { %v1552_v22 = vpop.eup %1551  ;;  %v422_v23 = vadd.f32 1.0, %v1550_v21  ;;  %1373 = vmatpush3.bf16.msra.mxu1 %v1531_v34 }
  0x6d   : > { %1355 = vmatpush3.bf16.msra.mxu0 %v1524_v18  ;;  %v423_v24 = vadd.f32 1.0, %v1552_v22  ;;  %1374 = vmatprep.subr.bf16.mxu1 %v1709_v0 }
  0x6e   : > { %1356 = vmatprep.subr.bf16.mxu0 %v1709_v0  ;;  %1553 = vrcp.f32 %v422_v23 }
  0x6f   : > { %1555 = vrcp.f32 %v423_v24 }
  0x70   : > { %1375 = vmatpush3.bf16.msra.mxu1 %v1532_v35 }
  0x71   : > { %1357 = vmatpush3.bf16.msra.mxu0 %v1525_v19  ;;  %1376 = vmatprep.subr.bf16.mxu1 %v1709_v0 }
  0x72   : > { %1358 = vmatprep.subr.bf16.mxu0 %v1709_v0 }
  0x74   : > { %1377 = vmatpush3.bf16.msra.mxu1 %v1533_v36 }
  0x75   : > { %1359 = vmatpush3.bf16.msra.mxu0 %v1526_v20  ;;  %1378 = vmatprep.subr.bf16.mxu1 %v1709_v0 }
  0x76   : > { %1384 = vmatprep.subr.bf16.mxu0 %v1709_v0 }
  0x78   : > { %v1554_v25 = vpop.eup %1553  ;;  %1379 = vmatpush3.bf16.msra.mxu1 %v1534_v37 }
  0x79   : > { %v1556_v26 = vpop.eup %1555  ;;  %v428_v27 = vmul.f32 %v1554_v25, %v414_v11  ;;  %1404 = vmatprep.subr.bf16.mxu1 %v1709_v0 }
  0x7a   : > { %v429_v28 = vmul.f32 %v1556_v26, %v415_v12 }
  0x7c   : > { %v430_v29 = vpack.c.bf16 %v429_v28, %v428_v27 }
  0x7e   : > { %1361 = vmatmul.mubr.bf16.vlgmr.msra.gmra.mrb[0].mxu0 %v430_v29 }
  0x7f   : > { %1400 = vmatprep.mubr.msk.bf16.mxu0 %vm1710_vm0, %v1709_v0  ;;  %1385 = vmatpush3.bf16.msra.mxu0 %v1535_v38 }
  0x80   : > { %1386 = vmatprep.subr.bf16.mxu0 %v1709_v0 }
  0x83   : > { %1387 = vmatpush3.bf16.msra.mxu0 %v1536_v39 }
  0x84   : > { %1388 = vmatprep.subr.bf16.mxu0 %v1709_v0 }
  0x87   : > { %1389 = vmatpush3.bf16.msra.mxu0 %v1537_v40 }
  0x88   : > { %1390 = vmatprep.subr.bf16.mxu0 %v1709_v0 }
  0x8b   : > { %1391 = vmatpush3.bf16.msra.mxu0 %v1538_v41 }
  0x8c   : > { %1392 = vmatprep.subr.bf16.mxu0 %v1709_v0 }
  0x8f   : > { %1393 = vmatpush3.bf16.msra.mxu0 %v1539_v42 }
  0x90   : > { %1394 = vmatprep.subr.bf16.mxu0 %v1709_v0 }
  0x93   : > { %1395 = vmatpush3.bf16.msra.mxu0 %v1540_v43 }
  0x94   : > { %1396 = vmatprep.subr.bf16.mxu0 %v1709_v0 }
  0x97   : > { %1397 = vmatpush3.bf16.msra.mxu0 %v1541_v1 }
  0x98   : > { %1398 = vmatprep.subr.bf16.mxu0 %v1709_v0 }
  0x9b   : > { %1399 = vmatpush3.bf16.msra.mxu0 %v1542_v2 }
 0x151   : > { %v536_v45 = vpop.f32.mrb[0].mxu0 }
 0x152   : > { %v537_v46 = vadd.f32 %v1265_v44, %v536_v45  ;;  %v1362_v47 = vpop.f32.mrb[1].mxu0 }
 0x153   : > { %v539_v48 = vpop.f32.mrb[2].mxu0 }
 0x154   : > { %v543_v49 = vsub.f32 0.0, %v537_v46  ;;  %v540_v50 = vadd.f32 %v1265_v44, %v539_v48  ;;  %v1363_v51 = vpop.f32.mrb[3].mxu0 }
 0x156   : > { %v545_v52 = vmul.f32 1.442695, %v543_v49  ;;  %v544_v53 = vsub.f32 0.0, %v540_v50 }
 0x158   : > { %1557 = vpow2.f32 %v545_v52  ;;  %v547_v54 = vmul.f32 1.442695, %v544_v53 }
 0x15a   : > { %1559 = vpow2.f32 %v547_v54 }
 0x162   : > { %v1558_v55 = vpop.eup %1557 }
 0x163   : > { %v549_v56 = vadd.f32 1.0, %v1558_v55 }
 0x164   : > { %v1560_v57 = vpop.eup %1559 }
 0x165   : > { %1561 = vrcp.f32 %v549_v56  ;;  %v550_v58 = vadd.f32 1.0, %v1560_v57 }
 0x167   : > { %1563 = vrcp.f32 %v550_v58 }
 0x16f   : > { %v1562_v59 = vpop.eup %1561 }
 0x170   : > { %v555_v61 = vmul.f32 %v1562_v59, %v537_v46 }
 0x171   : > { %v1564_v60 = vpop.eup %1563 }
 0x172   : > { %v556_v62 = vmul.f32 %v1564_v60, %v540_v50 }
 0x174   : > { %v557_v63 = vpack.c.bf16 %v556_v62, %v555_v61 }
 0x176   : > { %1381 = vmatmul.mubr.bf16.vlgmr.msra.gmra.mrb[0].mxu1 %v557_v63 }
 0x177   : > { %1416 = vmatprep.mubr.msk.bf16.mxu1 %vm1710_vm0, %v1709_v0 }
 0x249   : > { %v663_v6 = vpop.f32.mrb[0].mxu1 }
 0x24a   : > { %v664_v7 = vadd.f32 %v1274_v3, %v663_v6  ;;  %v1382_v8 = vpop.f32.mrb[1].mxu1 }
 0x24b   : > { %v666_v9 = vpop.f32.mrb[2].mxu1 }
 0x24c   : > { %v667_v10 = vadd.f32 %v1274_v3, %v666_v9  ;;  %v1383_v11 = vpop.f32.mrb[3].mxu1  ;;  %v670_v12 = vadd.f32 %v664_v7, %v1946_v4 }
 0x24e   : > { %v671_v13 = vadd.f32 %v667_v10, %v1948_v5 }
 0x250   : > { %v701_v14 = vpack.c.bf16 %v671_v13, %v670_v12 }
 0x252   : > { %1401 = vmatmul.mubr.bf16.vlgmr.msra.gmra.mrb[4].mxu0 %v701_v14 }
 0x325   : > { %v790_v16 = vpop.f32.mrb[4].mxu0 }
 0x326   : > { %v2033_v17 = vadd.f32 %v1283_v15, %v790_v16  ;;  %v1402_v18 = vpop.f32.mrb[5].mxu0 }
 0x327   : > { %v793_v19 = vpop.f32.mrb[6].mxu0 }
 0x328   : > { %v2035_v20 = vadd.f32 %v1283_v15, %v793_v19  ;;  %v1403_v21 = vpop.f32.mrb[7].mxu0  ;;  %v797_v22 = vmul.f32 %v2033_v17, %v2033_v17 }
 0x32a   : > { %809 = vrot.lane.b32.xlu1 %v797_v22, %s1711_s26  ;;  %801 = vrot.lane.b32.xlu0 %v797_v22, %s1712_s27  ;;  %v798_v4 = vmul.f32 %v2035_v20, %v2035_v20 }
 0x32e   : > { %811 = vrot.lane.b32.xlu1 %v798_v4, %s1711_s26  ;;  %803 = vrot.lane.b32.xlu0 %v798_v4, %s1712_s27 }
 0x39c   : > { %v810_v5 = vpop.permute.xlu1 %809  ;;  %v802_v23 = vpop.permute.xlu0 %801 }
 0x39d   : > { %v807_v24 = vadd.f32 %v802_v23, %v797_v22 }
 0x39f   : > { %v815_v25 = vadd.f32 %v810_v5, %v807_v24 }
 0x3a0   : > { %v804_v26 = vpop.permute.xlu0 %803  ;;  %v812_v29 = vpop.permute.xlu1 %811 }
 0x3a1   : > { %v817_v27 = vmax.f32 %v815_v25, 1e-24  ;;  %v808_v28 = vadd.f32 %v804_v26, %v798_v4 }
 0x3a3   : > { %1565 = vrsqrt.f32 %v817_v27  ;;  %v816_v30 = vadd.f32 %v812_v29, %v808_v28 }
 0x3a5   : > { %v818_v31 = vmax.f32 %v816_v30, 1e-24 }
 0x3a7   : > { %1567 = vrsqrt.f32 %v818_v31 }
 0x3ad   : > { %v1566_v32 = vpop.eup %1565 }
 0x3ae   : > { %823 = vrot.lane.b32.xlu0 %v1566_v32, %s1713_s28 }
 0x3b1   : > { %v1568_v33 = vpop.eup %1567 }
 0x3b2   : > { %829 = vrot.lane.b32.xlu0 %v1566_v32, %s1714_s13  ;;  %825 = vrot.lane.b32.xlu1 %v1568_v33, %s1713_s28 }
 0x3b6   : > { %845 = vrot.lane.b32.xlu0 %v2033_v17, %s1715_s20  ;;  %831 = vrot.lane.b32.xlu1 %v1568_v33, %s1714_s13 }
 0x3ba   : > { %847 = vrot.lane.b32.xlu1 %v2035_v20, %s1715_s20 }
 0x420   : > { %v824_v34 = vpop.permute.xlu0 %823 }
 0x421   : > { %v836_v35 = vsel %vm835_vm1, %v1566_v32, %v824_v34 }
 0x424   : > { %v826_v36 = vpop.permute.xlu1 %825  ;;  %v830_v37 = vpop.permute.xlu0 %829 }
 0x425   : > { %v839_v38 = vsel %vm838_vm2, %v836_v35, %v830_v37  ;;  %v837_v40 = vsel %vm835_vm1, %v1568_v33, %v826_v36 }
 0x426   : > { %v2056_v39 = vmul.f32 %v839_v38, %v2033_v17 }
 0x428   : > { %v832_v41 = vpop.permute.xlu1 %831  ;;  %v846_v42 = vpop.permute.xlu0 %845 }
 0x429   : > { %v840_v43 = vsel %vm838_vm2, %v837_v40, %v832_v41  ;;  %v851_v44 = vmul.f32 %v846_v42, %v2056_v39 }
 0x42a   : > { %v2062_v45 = vmul.f32 %v840_v43, %v2035_v20 }
 0x42b   : > { %855 = vrot.lane.b32.xlu0 %v851_v44, %s1712_s27 }
 0x42c   : > { %v848_v46 = vpop.permute.xlu1 %847 }
 0x42d   : > { %v852_v47 = vmul.f32 %v848_v46, %v2062_v45 }
 0x42f   : > { %857 = vrot.lane.b32.xlu1 %v852_v47, %s1712_s27  ;;  %863 = vrot.lane.b32.xlu0 %v851_v44, %s1711_s26 }
 0x433   : > { %865 = vrot.lane.b32.xlu1 %v852_v47, %s1711_s26 }
 0x49d   : > { %v856_v48 = vpop.permute.xlu0 %855 }
 0x49e   : > { %v861_v49 = vadd.f32 %v856_v48, %v851_v44 }
 0x4a1   : > { %v858_v50 = vpop.permute.xlu1 %857  ;;  %v864_v51 = vpop.permute.xlu0 %863 }
 0x4a2   : > { %v869_v52 = vadd.f32 %v864_v51, %v861_v49  ;;  %v862_v53 = vadd.f32 %v858_v50, %v852_v47 }
 0x4a4   : > { %873 = vrot.lane.b32.xlu0 %v869_v52, %s1713_s28 }
 0x4a5   : > { %v866_v54 = vpop.permute.xlu1 %865 }
 0x4a6   : > { %v870_v55 = vadd.f32 %v866_v54, %v862_v53 }
 0x4a8   : > { %875 = vrot.lane.b32.xlu1 %v870_v55, %s1713_s28  ;;  %879 = vrot.lane.b32.xlu0 %v869_v52, %s1714_s13  ;;  %s2171_s28 = scalar_lea.hbm %s2225_s10, %s1309_s21 }
 0x4ac   : > { %881 = vrot.lane.b32.xlu1 %v870_v55, %s1714_s13 }
 0x516   : > { %v874_v56 = vpop.permute.xlu0 %873 }
 0x517   : > { %v885_v57 = vsel %vm835_vm1, %v869_v52, %v874_v56 }
 0x51a   : > { %v876_v58 = vpop.permute.xlu1 %875  ;;  %v880_v59 = vpop.permute.xlu0 %879 }
 0x51b   : > { %v887_v60 = vsel %vm838_vm2, %v885_v57, %v880_v59  ;;  %v886_v62 = vsel %vm835_vm1, %v870_v55, %v876_v58  ;;  %v1543_v58 = vld [vmem:[%s2224_s9] sm:$0xff]  }
 0x51c   : > { %v889_v61 = vmul.f32 %v887_v60, %v2056_v39  ;;  %1405 = vmatpush3.bf16.msra.mxu1 %v1543_v58 }
 0x51d   : > { %1406 = vmatprep.subr.bf16.mxu1 %v1709_v0 }
 0x51e   : > { %v882_v63 = vpop.permute.xlu1 %881  ;;  %893 = vrot.lane.b32.xlu0 %v889_v61, %s1716_s29 }
 0x51f   : > { %v888_v1 = vsel %vm838_vm2, %v886_v62, %v882_v63  ;;  %v1544_v63 = vld [vmem:[%s2224_s9 + $0x8] sm:$0xff]  }
 0x520   : > { %v890_v2 = vmul.f32 %v888_v1, %v2062_v45  ;;  %1407 = vmatpush3.bf16.msra.mxu1 %v1544_v63 }
 0x521   : > { %1408 = vmatprep.subr.bf16.mxu1 %v1709_v0 }
 0x522   : > { %895 = vrot.lane.b32.xlu1 %v890_v2, %s1716_s29 }
 0x590   : > { %v894_v3 = vpop.permute.xlu0 %893 }
 0x591   : > { %v899_v6 = vsub.f32 %v2033_v17, %v894_v3 }
 0x593   : > { %v901_v7 = vmul.f32 %v899_v6, %v899_v6 }
 0x594   : > { %v896_v8 = vpop.permute.xlu1 %895 }
 0x595   : > { %v900_v9 = vsub.f32 %v2035_v20, %v896_v8  ;;  %905 = vrot.lane.b32.xlu0 %v901_v7, %s1712_s27  ;;  %v1546_v8 = vld [vmem:[%s2224_s9 + $0x18] sm:$0xff]  }
 0x597   : > { %v902_v10 = vmul.f32 %v900_v9, %v900_v9 }
 0x599   : > { %907 = vrot.lane.b32.xlu1 %v902_v10, %s1712_s27  ;;  %913 = vrot.lane.b32.xlu0 %v901_v7, %s1711_s26 }
 0x59d   : > { %915 = vrot.lane.b32.xlu1 %v902_v10, %s1711_s26 }
 0x607   : > { %v906_v11 = vpop.permute.xlu0 %905 }
 0x608   : > { %v911_v12 = vadd.f32 %v906_v11, %v901_v7  ;;  %v1514_v7 = vpack.i.bf16 %v2035_v20, %v2033_v17  ;;  %v1548_v17 = vld [vmem:[%s2224_s9 + $0x28] sm:$0xff]  }
 0x60b   : > { %v908_v13 = vpop.permute.xlu1 %907  ;;  %v914_v14 = vpop.permute.xlu0 %913 }
 0x60c   : > { %v919_v15 = vadd.f32 %v914_v14, %v911_v12  ;;  %v912_v16 = vadd.f32 %v908_v13, %v902_v10 }
 0x60e   : > { %v921_v18 = vmax.f32 %v919_v15, 1e-24 }
 0x60f   : > { %v916_v19 = vpop.permute.xlu1 %915 }
 0x610   : > { %1569 = vrsqrt.f32 %v921_v18  ;;  %v920_v21 = vadd.f32 %v916_v19, %v912_v16 }
 0x612   : > { %v922_v22 = vmax.f32 %v920_v21, 1e-24 }
 0x614   : > { %1571 = vrsqrt.f32 %v922_v22 }
 0x61a   : > { %v1570_v4 = vpop.eup %1569 }
 0x61b   : > { %927 = vrot.lane.b32.xlu0 %v1570_v4, %s1715_s20 }
 0x61e   : > { %v1572_v5 = vpop.eup %1571 }
 0x61f   : > { %929 = vrot.lane.b32.xlu1 %v1572_v5, %s1715_s20  ;;  %933 = vrot.lane.b32.xlu0 %v1570_v4, %s1711_s26  ;;  %s1631_s20 = scalar_lea.vmem %s2166_s19, 128 }
 0x620   : > { %p1632_p4 = scmp.ne.s32.totalorder %s2166_s19, %s1631_s20 }
 0x622   : > { %p1633_p6 = pnand %p1632_p4, %p1869_p12 }
 0x623   : > { %935 = vrot.lane.b32.xlu1 %v1572_v5, %s1711_s26  ;;  %939 = vrot.lane.b32.xlu0 %v1570_v4, %s1712_s27 }
 0x624   : > { %p1634_p8 = pneg %p1633_p6 }
 0x627   : > { %941 = vrot.lane.b32.xlu1 %v1572_v5, %s1712_s27 }
 0x68d   : > { %v928_v23 = vpop.permute.xlu0 %927 }
 0x691   : > { %v930_v24 = vpop.permute.xlu1 %929  ;;  %v934_v25 = vpop.permute.xlu0 %933 }
 0x692   : > { %v945_v26 = vsel %vm835_vm1, %v928_v23, %v934_v25 }
 0x695   : > { %v936_v27 = vpop.permute.xlu1 %935  ;;  %v940_v28 = vpop.permute.xlu0 %939 }
 0x696   : > { %v947_v29 = vsel %vm838_vm2, %v945_v26, %v940_v28  ;;  %v946_v30 = vsel %vm835_vm1, %v930_v24, %v936_v27 }
 0x697   : > { %951 = vrot.lane.b32.xlu0 %v947_v29, %s1716_s29 }
 0x699   : > { %v942_v31 = vpop.permute.xlu1 %941 }
 0x69a   : > { %v948_v32 = vsel %vm838_vm2, %v946_v30, %v942_v31 }
 0x69b   : > { %953 = vrot.lane.b32.xlu1 %v948_v32, %s1716_s29 }
 0x709   : > { %v952_v33 = vpop.permute.xlu0 %951 }
 0x70a   : > { %v2099_v34 = vmul.f32 %v952_v33, %v899_v6  ;;  %v1545_v6 = vld [vmem:[%s2224_s9 + $0x10] sm:$0xff]  }
 0x70b   : > { %1409 = vmatpush3.bf16.msra.mxu1 %v1545_v6 }
 0x70c   : > { %969 = vrot.lane.b32.xlu0 %v2099_v34, %s1711_s26  ;;  %1410 = vmatprep.subr.bf16.mxu1 %v1709_v0  ;;  %v1054_v29 = vsel %vm1053_vm3, %v2056_v39, %v2099_v34 }
 0x70d   : > { %v954_v35 = vpop.permute.xlu1 %953 }
 0x70e   : > { %v2103_v36 = vmul.f32 %v954_v35, %v900_v9  ;;  %v1547_v9 = vld [vmem:[%s2224_s9 + $0x20] sm:$0xff]  }
 0x70f   : > { %1411 = vmatpush3.bf16.msra.mxu1 %v1546_v8 }
 0x710   : > { %971 = vrot.lane.b32.xlu1 %v2103_v36, %s1711_s26  ;;  %995 = vrot.lane.b32.xlu0 %v2099_v34, %s1717_s11  ;;  %v1055_v28 = vsel %vm1053_vm3, %v2062_v45, %v2103_v36 }
 0x711   : > { %1412 = vmatprep.subr.bf16.mxu1 %v1709_v0 }
 0x713   : > { %1413 = vmatpush3.bf16.msra.mxu1 %v1547_v9 }
 0x714   : > { %997 = vrot.lane.b32.xlu1 %v2103_v36, %s1717_s11  ;;  %961 = vrot.lane.b32.xlu0 %v2099_v34, %s1718_s24  ;;  %s1720_s11 = smov [#allocation7]  }
 0x715   : > { %1414 = vmatprep.subr.bf16.mxu1 %v1709_v0 }
 0x717   : > { %1415 = vmatpush3.bf16.msra.mxu1 %v1548_v17 }
 0x718   : > { %963 = vrot.lane.b32.xlu1 %v2103_v36, %s1718_s24  ;;  %987 = vrot.lane.b32.xlu0 %v2099_v34, %s1712_s27  ;;  %s1635_s24 = sshll.u32 %s1720_s11, 4  ;;  %s1636_s24 = int_to_ptr.vmem [resolvable:$false] %s1635_s24 }
 0x719   : > { %p1638_p10 = scmp.lt.s32.totalorder %s2166_s19, %s1636_s24 }
 0x71c   : > { %989 = vrot.lane.b32.xlu1 %v2103_v36, %s1712_s27 }
 0x77e   : > { %v970_v37 = vpop.permute.xlu0 %969 }
 0x77f   : > { %v975_v38 = vmul.f32 %v970_v37, %v2056_v39 }
 0x781   : > { %979 = vrot.lane.b32.xlu0 %v975_v38, %s1712_s27 }
 0x782   : > { %v972_v40 = vpop.permute.xlu1 %971  ;;  %v996_v41 = vpop.permute.xlu0 %995 }
 0x783   : > { %v976_v42 = vmul.f32 %v972_v40, %v2062_v45  ;;  %v1001_v43 = vmul.f32 %v996_v41, %v2056_v39 }
 0x785   : > { %981 = vrot.lane.b32.xlu1 %v976_v42, %s1712_s27  ;;  %1005 = vrot.lane.b32.xlu0 %v1001_v43, %s1714_s13 }
 0x786   : > { %v998_v44 = vpop.permute.xlu1 %997  ;;  %v962_v47 = vpop.permute.xlu0 %961 }
 0x787   : > { %v1002_v46 = vmul.f32 %v998_v44, %v2062_v45  ;;  %v967_v52 = vmul.f32 %v962_v47, %v2056_v39 }
 0x789   : > { %1007 = vrot.lane.b32.xlu1 %v1002_v46, %s1714_s13 }
 0x78a   : > { %v964_v48 = vpop.permute.xlu1 %963  ;;  %v988_v49 = vpop.permute.xlu0 %987 }
 0x78b   : > { %v968_v53 = vmul.f32 %v964_v48, %v2062_v45  ;;  %v993_v59 = vmul.f32 %v988_v49, %v2056_v39 }
 0x78e   : > { %v990_v50 = vpop.permute.xlu1 %989 }
 0x78f   : > { %v994_v60 = vmul.f32 %v990_v50, %v2062_v45 }
 0x7f3   : > { %v980_v51 = vpop.permute.xlu0 %979 }
 0x7f4   : > { %v985_v55 = vsub.f32 %v967_v52, %v980_v51 }
 0x7f7   : > { %v982_v54 = vpop.permute.xlu1 %981  ;;  %v1006_v57 = vpop.permute.xlu0 %1005 }
 0x7f8   : > { %v986_v56 = vsub.f32 %v968_v53, %v982_v54  ;;  %v1011_v1 = vsub.f32 %v993_v59, %v1006_v57 }
 0x7fa   : > { %v1494_v61 = vpack.i.bf16 %v986_v56, %v985_v55 }
 0x7fb   : > { %v1008_v62 = vpop.permute.xlu1 %1007 }
 0x7fc   : > { %v1012_v2 = vsub.f32 %v994_v60, %v1008_v62  ;;  %1495 = vrot.lane.b32.xlu0 %v1494_v61, %s1712_s27 }
 0x7fe   : > { %v1499_v3 = vpack.i.bf16 %v1012_v2, %v1011_v1 }
 0x800   : > { %1505 = vrot.lane.b32.xlu0 %v1494_v61, %s1714_s13  ;;  %1500 = vrot.lane.b32.xlu1 %v1499_v3, %s1712_s27  ;;  %s1637_s27 = scalar_lea.vmem %s1636_s24, 256 }
 0x801   : > { %p1639_p13 = scmp.lt.s32.totalorder %s1637_s27, %s1631_s20 }
 0x803   : > { %p1640_p3 = por %p1639_p13, %p1638_p10 }
 0x804   : > { %1515 = vrot.lane.b32.xlu0 %v1514_v7, %s1716_s29  ;;  %s1719_s29 = smov 48  }
 0x805   : > { %p1641_p7 = pnand %p1640_p3, %p1634_p8 }
 0x86e   : > { %v1496_v20 = vpop.permute.xlu0 %1495 }
 0x86f   : > { %v1498_v10 = vunpack.i.h.bf16 %v1496_v20  ;;  %v1497_v11 = vunpack.i.l.bf16 %v1496_v20 }
 0x872   : > { %v1501_v12 = vpop.permute.xlu1 %1500  ;;  %v1506_v13 = vpop.permute.xlu0 %1505 }
 0x873   : > { %v1503_v14 = vunpack.i.h.bf16 %v1501_v12  ;;  %v1502_v15 = vunpack.i.l.bf16 %v1501_v12  ;;  %v1508_v16 = vunpack.i.h.bf16 %v1506_v13  ;;  %v1507_v18 = vunpack.i.l.bf16 %v1506_v13 }
 0x875   : > { %v1035_v19 = vsel %vm835_vm1, %v1497_v11, %v1502_v15  ;;  %v1036_v21 = vsel %vm835_vm1, %v1498_v10, %v1503_v14 }
 0x876   : > { %v1037_v0 = vsel %vm838_vm2, %v1035_v19, %v1507_v18  ;;  %v1038_v22 = vsel %vm838_vm2, %v1036_v21, %v1508_v16  ;;  %v1516_v5 = vpop.permute.xlu0 %1515 }
 0x877   : > { %v1509_v4 = vpack.i.bf16 %v1038_v22, %v1037_v0  ;;  %v1518_v26 = vunpack.i.h.bf16 %v1516_v5  ;;  %v1517_v27 = vunpack.i.l.bf16 %v1516_v5 }
 0x879   : > { %1510 = vrot.lane.b32.xlu1 %v1509_v4, %s1719_s29 }
 0x8eb   : > { %v1511_v23 = vpop.permute.xlu1 %1510 }
 0x8ec   : > { %v1513_v24 = vunpack.i.h.bf16 %v1511_v23  ;;  %v1512_v25 = vunpack.i.l.bf16 %v1511_v23 }
 0x8ee   : > { %v1058_v30 = vsel %vm1056_vm4, %v1055_v28, %v1513_v24  ;;  %v1057_v31 = vsel %vm1056_vm4, %v1054_v29, %v1512_v25 }
 0x8ef   : > { %v1061_v32 = vsel %vm1059_vm5, %v1058_v30, %v1518_v26  ;;  %v1060_v33 = vsel %vm1059_vm5, %v1057_v31, %v1517_v27 }
 0x8f0   : > { %v1062_v35 = vpack.c.bf16 %v1061_v32, %v1060_v33 }
 0x8f2   : > { %1417 = vmatmul.mubr.msk.bf16.vlgmr.msra.gmra.mrb[4].mxu1 %vm1099_vm6, %v1062_v35 }
 0x9c5   : > { %v1137_v37 = vpop.f32.mrb[4].mxu1 }
 0x9c6   : > { %v1307_v38 = vpack.c.bf16 %v1137_v37, %v1137_v37  ;;  %v1418_v39 = vpop.f32.mrb[5].mxu1 }
 0x9c7   : > { %v1140_v45 = vpop.f32.mrb[6].mxu1 }
 0x9c8   : > { %1153 = vst.msk [vmem:[%s392_s23] sm:$0xf] %vm1152_vm7, %v1307_v38  ;;  %v1308_v34 = vpack.c.bf16 %v1140_v45, %v1140_v45  ;;  %v1419_v36 = vpop.f32.mrb[7].mxu1 }
 0x9ca   : > { %1154 = vst.msk [vmem:[%s392_s23 + $0x4] sm:$0xf] %vm1152_vm7, %v1308_v34 }
 0x9cb   : > { %1644 = shalt.err (!%p1641_p7)
}
 0x9cc   : > { %s1645_s13 = scalar_lea.hbm %s2171_s28, 128  ;;  %s1649_s23 = scalar_lea.hbm %s2225_s10, 256 }
 0x9cd   : > { %p1646_p9 = scmp.ne.s32.totalorder %s2171_s28, %s1645_s13  ;;  %p1650_p5 = scmp.lt.u32.totalorder %s2171_s28, %s2225_s10 }
 0x9ce   : > { %p1651_p1 = scmp.lt.u32.totalorder %s1649_s23, %s1645_s13  ;;  %p1653_p4 = scmp.lt.u32.totalorder %s1645_s13, %s2171_s28 }
 0x9cf   : > { %p1647_p2 = pnand %p1646_p9, %p1869_p12 }
 0x9d0   : > { %p1652_p11 = por %p1651_p1, %p1650_p5 }
 0x9d1   : > { %p1648_p0 = pneg %p1647_p2 }
 0x9d2   : > { %p1654_p6 = por %p1653_p4, %p1652_p11 }
 0x9d4   : > { %p1655_p8 = pnand %p1654_p6, %p1648_p0 }
 0x9d6   : > { %1658 = shalt.err (!%p1655_p8)
}
 0x9d7   : > { %s1721_s26 = smov 64   ;;  %s1722_s20 = smov 4  }
 0x9d8   : > { %1426 = dma.vmem_to_hbm [thread:$0]  (%p1869_p12), %s2166_s19, 128, %s2171_s28, %s1156_s17, %s1721_s26, %s1721_s26, %s1722_s20  }
 0x9d9 PF: > { %s2247_s11 = sld [smem:[#allocation11_spill]]  ;;  %s2248_s24 = sld [smem:[#allocation12_spill]] }
 0x9da   : > { %p2250_p13 = scmp.ge.s32.totalorder %s1701_s16, 2 }
 0x9df   : > { %s1184_s27 = sand.u32 1, %s2247_s11   ;;  %p2249_p10 = scmp.ne.s32.totalorder %s2248_s24, 0 }
 0x9e0   : > { %s1185_s13 = scalar_lea.sflag [#allocation4], %s1184_s27 }
 0x9e1   : > { %p1437_p3 = pnand %p2250_p13, %p2249_p10 }
 0x9e3   : > { %1684 = dma.done.wait (!%p1437_p3), %s1185_s13, 128  }
 0x9e4   : > { %1686 = vsyncadd (!%p1437_p3), %s1185_s13, 4294967168  ;;  %s2251_s16 = sld [smem:[#allocation13_spill]]  ;;  %s2252_s13 = smov %s1693_s14 }
 0x9e5   : > { %s2253_s14 = smov %s1697_s15  ;;  %s2254_s15 = smov %s1865_s25 }
 0x9ea   : > { %p24_p7 = scmp.ge.s32.totalorder %s2251_s16, 4  }
 0x9ec   :  { %26 = sbr.rel (!%p24_p7) target bundleno = 6 (0x6), region = 109 }
 0x9f3   :  { %1190 = vsyncpa [#allocation3], 1 }
 0x9f4   :  { %1192 = vsyncpa [#allocation3 + $0x1], 1 }
 0x9f5   :  { %1193 = vsyncpa [#allocation6], 1 }
 0x9f6   :  { %1194 = vsyncpa [#allocation4], 1 }
 0x9f7   :  { %1196 = vsyncpa [#allocation4 + $0x1], 1 }

</bundles_post_ra>
